<compile_context>
chip_gen: v7x
topology: tpu7x:2x2x1
jax: 0.10.0
libtpu: 0.0.40
codegen_flags: <defaults>
</compile_context>

<pallas_src>
import functools

import jax
import jax.numpy as jnp
from jax.experimental import pallas as pl
from jax.experimental.pallas import tpu as pltpu


def _focal_loss_kernel(*refs, gamma, n_valid, tile_n, tiles_per_par, use_alpha):
    if use_alpha:
        logits_ref, tgt_ref, alphat_ref, out_ref = refs
    else:
        logits_ref, tgt_ref, out_ref = refs
        alphat_ref = None

    p = pl.program_id(0)   # "parallel" split of the batch (2 TCs on v7x)
    i = pl.program_id(1)   # "arbitrary" reduction over this core's batch tiles

    @pl.when(i == 0)
    def _():
        out_ref[...] = jnp.zeros_like(out_ref)

    # Unclamped global tile index -> first row covered by this tile.  Rows past
    # n_valid (ragged / padded tail, or a clamped duplicated tile in the rare
    # unbalanced-split fallback) are masked out below.
    g = p * tiles_per_par + i
    row0 = g * tile_n

    x = logits_ref[...].astype(jnp.float32)            # (tile_n, C)
    t = tgt_ref[...]                                   # (tile_n, 1) int32

    # target logit via a boolean mask (no float one-hot materialized)
    col = jax.lax.broadcasted_iota(jnp.int32, x.shape, 1)
    is_tgt = col == t                                  # (tile_n, C) bool

    # cross entropy per row: logsumexp(x) - x[target] (max-stabilized)
    m = jnp.max(x, axis=1, keepdims=True)
    lse = m + jnp.log(jnp.sum(jnp.exp(x - m), axis=1, keepdims=True))
    tgt_logit = jnp.sum(jnp.where(is_tgt, x, 0.0), axis=1, keepdims=True)
    ce = lse - tgt_logit                               # (tile_n, 1)

    # focal modulation: (1 - pt)^gamma * ce
    # NOTE: pt = exp(-ce) can exceed 1 by a ULP when ce rounds slightly
    # negative, making (1 - pt) slightly negative.  Harmless for the even
    # integer-gamma repeated multiply; the pow path clamps the base to >= 0.
    pt = jnp.exp(-ce)
    one_minus_pt = 1.0 - pt
    g_int = int(round(float(gamma)))
    if abs(float(gamma) - g_int) < 1e-12 and 0 <= g_int <= 16:
        # integer gamma: exact repeated multiply on the VPU (no EUP log/exp)
        w = jnp.ones_like(one_minus_pt)
        for _ in range(g_int):
            w = w * one_minus_pt
    else:
        w = jnp.maximum(one_minus_pt, 0.0) ** gamma
    focal = w * ce                                     # (tile_n, 1)

    if use_alpha:
        # per-row alpha[target], gathered in the wrapper
        focal = alphat_ref[...].astype(jnp.float32) * focal

    # mask rows past the true batch size
    local = jax.lax.broadcasted_iota(jnp.int32, focal.shape, 0)
    valid = (row0 + local) < n_valid
    focal = jnp.where(valid, focal, 0.0)

    # reduce this tile to one scalar partial and accumulate it at [0, 0] of the
    # resident (8, 128) output block (no (tile, 1) VMEM accumulator).
    part = jnp.sum(focal)
    r = jax.lax.broadcasted_iota(jnp.int32, out_ref.shape, 0)
    c = jax.lax.broadcasted_iota(jnp.int32, out_ref.shape, 1)
    out_ref[...] += jnp.where((r == 0) & (c == 0), part, 0.0)


def _vmem_budget_and_limit():
    """Tile-sizing budget and vmem_limit_bytes derived from the chip's VMEM."""
    phys = 0
    try:
        info = pltpu.get_tpu_info()
        phys = int(getattr(info, "vmem_capacity_bytes", 0) or 0)
    except Exception:
        phys = 0
    if phys >= (96 << 20):            # v5e / v6e: 128 MiB physical VMEM
        return 56 << 20, 88 << 20
    # v7x (64 MiB physical per TC) or unknown: stay conservative
    return 28 << 20, 44 << 20


def _auto_n_par():
    """2 on dual-TensorCore chips (v7x), else 1."""
    try:
        kind = (getattr(jax.devices()[0], "device_kind", "") or "").lower()
        if "v7" in kind:
            return 2
    except Exception:
        pass
    return 1


def focal_loss(inputs, targets, *, gamma=2.0, alpha=None, reduction="mean",
               tile_n=None, n_par=None):
    """Focal loss. inputs: (N, C) float logits, targets: (N,) int class ids."""
    N, C = inputs.shape

    # pad the batch to a multiple of 8; padded / out-of-bounds rows are masked
    # in-kernel against the true batch size N.
    n_pad = (-N) % 8
    if n_pad:
        inputs = jnp.pad(inputs, ((0, n_pad), (0, 0)))
    n_rows = N + n_pad

    targets_i32 = targets.astype(jnp.int32)
    targets_p = jnp.pad(targets_i32, (0, n_pad)) if n_pad else targets_i32
    targets2d = targets_p.reshape(n_rows, 1)

    use_alpha = alpha is not None
    if use_alpha:
        # hoist the per-class weight gather out of the kernel (plain XLA
        # gather, O(N)); fed to the kernel as a (tile, 1) operand like targets.
        alpha_t = jnp.asarray(alpha, jnp.float32).reshape(C)[targets_i32]
        if n_pad:
            alpha_t = jnp.pad(alpha_t, (0, n_pad))
        alpha2d = alpha_t.reshape(n_rows, 1)

    # ---- tile sizing from the chip's VMEM capacity --------------------------
    lane_c = ((C + 127) // 128) * 128               # lane padding of (., C)
    budget, vmem_limit = _vmem_budget_and_limit()
    # per-row bytes: double-buffered logits block + ~3 live full-tile f32
    # temporaries in the body + double-buffered lane-padded (., 1) operands.
    per_row = (2 + 3) * lane_c * 4 + 2 * 128 * 4 + (2 * 128 * 4 if use_alpha else 0)
    tile = max(8, min(8192, (budget // per_row) // 8 * 8))
    if tile_n is not None:
        tile = min(tile, max(8, ((int(tile_n) + 7) // 8) * 8))
    tile = min(tile, n_rows)

    n_tiles = -(-n_rows // tile)

    # ---- TensorCore split ----------------------------------------------------
    if n_par is None:
        n_par = _auto_n_par()
    n_par = max(1, min(int(n_par), 2))
    if n_par > n_tiles:
        n_par = 1
    tiles_per_par = -(-n_tiles // n_par)
    if n_par > 1 and n_tiles % n_par != 0:
        # one-shot tile adjustment so each core gets the same number of
        # distinct tiles (no duplicated, fully-masked tail tile).
        want = tiles_per_par * n_par
        cand_tile = max(8, ((-(-n_rows // want) + 7) // 8) * 8)
        cand_tiles = -(-n_rows // cand_tile)
        if cand_tiles % n_par == 0:
            tile, n_tiles = cand_tile, cand_tiles
            tiles_per_par = n_tiles // n_par
    exact = (n_par * tiles_per_par == n_tiles)

    if exact:
        def _blk(p_, i_):
            return p_ * tiles_per_par + i_
    else:
        # rare fallback: clamp duplicated trailing steps onto the last real
        # tile; the kernel masks them out via the unclamped global tile index.
        def _blk(p_, i_):
            return jnp.minimum(p_ * tiles_per_par + i_, n_tiles - 1)

    operands = [inputs, targets2d]
    in_specs = [
        pl.BlockSpec((tile, C), lambda p_, i_: (_blk(p_, i_), 0)),
        pl.BlockSpec((tile, 1), lambda p_, i_: (_blk(p_, i_), 0)),
    ]
    if use_alpha:
        operands.append(alpha2d)
        in_specs.append(pl.BlockSpec((tile, 1), lambda p_, i_: (_blk(p_, i_), 0)))

    kernel = functools.partial(
        _focal_loss_kernel, gamma=float(gamma), n_valid=N, tile_n=tile,
        tiles_per_par=tiles_per_par, use_alpha=use_alpha)

    partials = pl.pallas_call(
        kernel,
        out_shape=jax.ShapeDtypeStruct((n_par * 8, 128), jnp.float32),
        grid_spec=pltpu.PrefetchScalarGridSpec(
            num_scalar_prefetch=0,
            grid=(n_par, tiles_per_par),
            in_specs=in_specs,
            out_specs=pl.BlockSpec((8, 128), lambda p_, i_: (p_, 0)),
        ),
        compiler_params=pltpu.CompilerParams(
            dimension_semantics=("parallel", "arbitrary"),
            vmem_limit_bytes=int(vmem_limit)),
    )(*operands)

    # each per-core (8, 128) block holds that core's partial sum at [0, 0]
    total = jnp.sum(partials.reshape(n_par, 8, 128)[:, 0, 0])
    if reduction == "mean":
        return total / jnp.float32(N)
    elif reduction == "sum":
        return total
    else:
        # TODO(synk): reduction='none' needs a per-row output spec; not implemented.
        raise NotImplementedError("reduction='none' is not implemented")


def _reference_focal_loss(inputs, targets, gamma, alpha):
    x = inputs.astype(jnp.float32)
    lse = jax.scipy.special.logsumexp(x, axis=1)
    ce = lse - jnp.take_along_axis(x, targets[:, None], axis=1)[:, 0]
    pt = jnp.exp(-ce)
    fl = (1.0 - pt) ** gamma * ce
    if alpha is not None:
        fl = jnp.asarray(alpha, jnp.float32)[targets] * fl
    return jnp.mean(fl)


if __name__ == "__main__":
    key = jax.random.PRNGKey(0)
    N, C = 64, 16
    k1, k2 = jax.random.split(key)
    inputs = jax.random.normal(k1, (N, C), jnp.float32) * 2.0
    targets = jax.random.randint(k2, (N,), 0, C, jnp.int32)
    alpha = jnp.linspace(0.25, 1.0, C, dtype=jnp.float32)

    # 1) alpha-weighted, auto tiling / auto core split
    loss = focal_loss(inputs, targets, gamma=2.0, alpha=alpha)
    jax.block_until_ready(loss)
    ref = _reference_focal_loss(inputs, targets, 2.0, alpha)
    assert jnp.allclose(loss, ref, rtol=1e-5, atol=1e-6), (loss, ref)

    # 2) unweighted (alpha=None) specialized kernel
    loss2 = focal_loss(inputs, targets, gamma=2.0, alpha=None)
    ref2 = _reference_focal_loss(inputs, targets, 2.0, None)
    assert jnp.allclose(loss2, ref2, rtol=1e-5, atol=1e-6), (loss2, ref2)

    # 3) ragged batch, multi-tile path (small explicit tile cap)
    N3 = 72
    k3, k4 = jax.random.split(k2)
    inputs3 = jax.random.normal(k3, (N3, C), jnp.float32) * 2.0
    targets3 = jax.random.randint(k4, (N3,), 0, C, jnp.int32)
    loss3 = focal_loss(inputs3, targets3, gamma=2.0, alpha=None, tile_n=32)
    ref3 = _reference_focal_loss(inputs3, targets3, 2.0, None)
    assert jnp.allclose(loss3, ref3, rtol=1e-5, atol=1e-6), (loss3, ref3)

    # 4) explicit 2-way split (exercises the balanced split / masked fallback
    #    even on single-TC chips)
    loss4 = focal_loss(inputs3, targets3, gamma=2.0, alpha=alpha, tile_n=16, n_par=2)
    ref4 = _reference_focal_loss(inputs3, targets3, 2.0, alpha)
    assert jnp.allclose(loss4, ref4, rtol=1e-5, atol=1e-6), (loss4, ref4)

    jax.block_until_ready((loss, loss2, loss3, loss4))
    print("KERNEL_OK")
</pallas_src>

<mosaic_0001>
module attributes {stable_mosaic.version = 11 : i64} {
  func.func @_focal_loss_kernel(%arg0: i32, %arg1: i32, %arg2: memref<64x16xf32, #tpu.memory_space<vmem>>, %arg3: memref<64x1xi32, #tpu.memory_space<vmem>>, %arg4: memref<64x1xf32, #tpu.memory_space<vmem>>, %arg5: memref<8x128xf32, #tpu.memory_space<vmem>>) attributes {dimension_semantics = [#tpu.dimension_semantics<parallel>, #tpu.dimension_semantics<arbitrary>], iteration_bounds = array<i64: 1, 1>, scalar_prefetch = 0 : i64, scratch_operands = 0 : i64, tpu.core_type = #tpu.core_type<tc>, window_params = [{transform_indices = @transform_0, window_bounds = array<i64: 64, 16>}, {transform_indices = @transform_1, window_bounds = array<i64: 64, 1>}, {transform_indices = @transform_2, window_bounds = array<i64: 64, 1>}, {transform_indices = @transform_3, window_bounds = array<i64: 8, 128>}]} {
    %c0_i32 = arith.constant 0 : i32
    %0 = arith.cmpi eq, %arg1, %c0_i32 : i32
    %1 = arith.extui %0 : i1 to i32
    %c0_i32_0 = arith.constant 0 : i32
    %2 = arith.cmpi ne, %1, %c0_i32_0 : i32
    scf.if %2 {
      %cst_22 = arith.constant 0.000000e+00 : f32
      %60 = vector.broadcast %cst_22 : f32 to vector<8x128xf32>
      %c0_23 = arith.constant 0 : index
      %c0_24 = arith.constant 0 : index
      %61 = vector.load %arg5[%c0_23, %c0_24] : memref<8x128xf32, #tpu.memory_space<vmem>>, vector<8x128xf32>
      tpu.vector_store %arg5[%c0_23, %c0_24], %60 {strides = array<i32>} : memref<8x128xf32, #tpu.memory_space<vmem>>, vector<8x128xf32>,
    } else {
    }
    %c1_i32 = arith.constant 1 : i32
    %3 = arith.muli %arg0, %c1_i32 : i32
    %4 = arith.addi %3, %arg1 : i32
    %c64_i32 = arith.constant 64 : i32
    %5 = arith.muli %4, %c64_i32 : i32
    %c0 = arith.constant 0 : index
    %c0_1 = arith.constant 0 : index
    %6 = vector.load %arg2[%c0, %c0_1] : memref<64x16xf32, #tpu.memory_space<vmem>>, vector<64x16xf32>
    %c0_2 = arith.constant 0 : index
    %c0_3 = arith.constant 0 : index
    %7 = vector.load %arg3[%c0_2, %c0_3] : memref<64x1xi32, #tpu.memory_space<vmem>>, vector<64x1xi32>
    %8 = tpu.iota {dimensions = array<i32: 1>} : vector<64x16xi32>
    %9 = vector.broadcast %7 : vector<64x1xi32> to vector<64x16xi32>
    %10 = arith.cmpi eq, %8, %9 : vector<64x16xi32>
    %cst = arith.constant dense<0xFF800000> : vector<64xf32>
    %11 = vector.multi_reduction <maximumf>, %6, %cst [1] : vector<64x16xf32> to vector<64xf32>
    %12 = vector.shape_cast %11 : vector<64xf32> to vector<64x1xf32>
    %13 = vector.broadcast %12 : vector<64x1xf32> to vector<64x16xf32>
    %14 = arith.subf %6, %13 : vector<64x16xf32>
    %15 = math.exp %14 : vector<64x16xf32>
    %cst_4 = arith.constant dense<0.000000e+00> : vector<64xf32>
    %16 = vector.multi_reduction <add>, %15, %cst_4 [1] : vector<64x16xf32> to vector<64xf32>
    %17 = vector.shape_cast %16 : vector<64xf32> to vector<64x1xf32>
    %18 = math.log %17 : vector<64x1xf32>
    %19 = arith.addf %12, %18 : vector<64x1xf32>
    %cst_5 = arith.constant 0.000000e+00 : f32
    %20 = vector.broadcast %cst_5 : f32 to vector<64x16xf32>
    %21 = arith.select %10, %6, %20 : vector<64x16xi1>, vector<64x16xf32>
    %cst_6 = arith.constant dense<0.000000e+00> : vector<64xf32>
    %22 = vector.multi_reduction <add>, %21, %cst_6 [1] : vector<64x16xf32> to vector<64xf32>
    %23 = vector.shape_cast %22 : vector<64xf32> to vector<64x1xf32>
    %24 = arith.subf %19, %23 : vector<64x1xf32>
    %cst_7 = arith.constant 0.000000e+00 : f32
    %25 = vector.broadcast %cst_7 : f32 to vector<64x1xf32>
    %26 = arith.subf %25, %24 : vector<64x1xf32>
    %27 = math.exp %26 : vector<64x1xf32>
    %cst_8 = arith.constant 1.000000e+00 : f32
    %28 = vector.broadcast %cst_8 : f32 to vector<64x1xf32>
    %29 = arith.subf %28, %27 : vector<64x1xf32>
    %cst_9 = arith.constant 1.000000e+00 : f32
    %30 = vector.broadcast %cst_9 : f32 to vector<64x1xf32>
    %31 = arith.mulf %30, %29 : vector<64x1xf32>
    %32 = arith.mulf %31, %29 : vector<64x1xf32>
    %33 = arith.mulf %32, %24 : vector<64x1xf32>
    %c0_10 = arith.constant 0 : index
    %c0_11 = arith.constant 0 : index
    %34 = vector.load %arg4[%c0_10, %c0_11] : memref<64x1xf32, #tpu.memory_space<vmem>>, vector<64x1xf32>
    %35 = arith.mulf %34, %33 : vector<64x1xf32>
    %36 = tpu.iota {dimensions = array<i32: 0>} : vector<64x1xi32>
    %37 = vector.broadcast %5 : i32 to vector<64x1xi32>
    %38 = arith.addi %37, %36 : vector<64x1xi32>
    %c64_i32_12 = arith.constant 64 : i32
    %39 = vector.broadcast %c64_i32_12 : i32 to vector<64x1xi32>
    %40 = arith.cmpi slt, %38, %39 : vector<64x1xi32>
    %cst_13 = arith.constant 0.000000e+00 : f32
    %41 = vector.broadcast %cst_13 : f32 to vector<64x1xf32>
    %42 = arith.select %40, %35, %41 : vector<64x1xi1>, vector<64x1xf32>
    %43 = vector.shape_cast %42 : vector<64x1xf32> to vector<1x64x1xf32>
    %cst_14 = arith.constant dense<0.000000e+00> : vector<1xf32>
    %44 = vector.multi_reduction <add>, %43, %cst_14 [1, 2] : vector<1x64x1xf32> to vector<1xf32>
    %45 = vector.shape_cast %44 : vector<1xf32> to vector<1x1x1xf32>
    %46 = vector.extract %45[0, 0, 0] : f32 from vector<1x1x1xf32>
    %47 = tpu.iota {dimensions = array<i32: 0>} : vector<8x128xi32>
    %48 = tpu.iota {dimensions = array<i32: 1>} : vector<8x128xi32>
    %c0_15 = arith.constant 0 : index
    %c0_16 = arith.constant 0 : index
    %49 = vector.load %arg5[%c0_15, %c0_16] : memref<8x128xf32, #tpu.memory_space<vmem>>, vector<8x128xf32>
    %c0_i32_17 = arith.constant 0 : i32
    %50 = vector.broadcast %c0_i32_17 : i32 to vector<8x128xi32>
    %51 = arith.cmpi eq, %47, %50 : vector<8x128xi32>
    %c0_i32_18 = arith.constant 0 : i32
    %52 = vector.broadcast %c0_i32_18 : i32 to vector<8x128xi32>
    %53 = arith.cmpi eq, %48, %52 : vector<8x128xi32>
    %54 = arith.andi %51, %53 : vector<8x128xi1>
    %cst_19 = arith.constant 0.000000e+00 : f32
    %55 = vector.broadcast %46 : f32 to vector<8x128xf32>
    %56 = vector.broadcast %cst_19 : f32 to vector<8x128xf32>
    %57 = arith.select %54, %55, %56 : vector<8x128xi1>, vector<8x128xf32>
    %58 = arith.addf %49, %57 : vector<8x128xf32>
    %c0_20 = arith.constant 0 : index
    %c0_21 = arith.constant 0 : index
    %59 = vector.load %arg5[%c0_20, %c0_21] : memref<8x128xf32, #tpu.memory_space<vmem>>, vector<8x128xf32>
    tpu.vector_store %arg5[%c0_20, %c0_21], %58 {strides = array<i32>} : memref<8x128xf32, #tpu.memory_space<vmem>>, vector<8x128xf32>,
    return
  }
  func.func @transform_0(%arg0: i32, %arg1: i32) -> (i32, i32) {
    %c1_i32 = arith.constant 1 : i32
    %0 = arith.muli %arg0, %c1_i32 : i32
    %1 = arith.addi %0, %arg1 : i32
    %c0_i32 = arith.constant 0 : i32
    %c0_i32_0 = arith.constant 0 : i32
    return %1, %c0_i32 : i32, i32
  }
  func.func @transform_1(%arg0: i32, %arg1: i32) -> (i32, i32) {
    %c1_i32 = arith.constant 1 : i32
    %0 = arith.muli %arg0, %c1_i32 : i32
    %1 = arith.addi %0, %arg1 : i32
    %c0_i32 = arith.constant 0 : i32
    %c0_i32_0 = arith.constant 0 : i32
    return %1, %c0_i32 : i32, i32
  }
  func.func @transform_2(%arg0: i32, %arg1: i32) -> (i32, i32) {
    %c1_i32 = arith.constant 1 : i32
    %0 = arith.muli %arg0, %c1_i32 : i32
    %1 = arith.addi %0, %arg1 : i32
    %c0_i32 = arith.constant 0 : i32
    %c0_i32_0 = arith.constant 0 : i32
    return %1, %c0_i32 : i32, i32
  }
  func.func @transform_3(%arg0: i32, %arg1: i32) -> (i32, i32) {
    %c0_i32 = arith.constant 0 : i32
    %c0_i32_0 = arith.constant 0 : i32
    return %arg0, %c0_i32 : i32, i32
  }
}

</mosaic_0001>

<bundles_post_ra>
// kernel: tpu_custom_call.1
= control target key start
LH: loop header
LB: loop body
LE: loop exit
PB: predicated region body
PF: predicated region fallthrough
CT: control target
= control target key end

     0   :  { %vm138_vm0 = vcmask 130048   ;;  %v517_v6 = vmov 0   ;;  %s756_s0 = inlined_call_operand.vmem [shape: f32[64,16], index: 0, kind: input, shape index: {}]   ;;  %s757_s1 = inlined_call_operand.vmem [shape: s32[64,1], index: 1, kind: input, shape index: {}]   ;;  %s758_s2 = inlined_call_operand.vmem [shape: f32[64,1], index: 2, kind: input, shape index: {}]   ;;  %s759_s3 = inlined_call_operand.hbm [shape: f32[8,128], index: 3, kind: output, shape index: {}]  }
   0x1   :  { %v542_v0 = vld [vmem:[%s756_s0 + $0x10] sm:$0xff]  ;;  %v547_v1 = vld [vmem:[%s756_s0] sm:$0xff]  ;;  %v552_v2 = vld [vmem:[%s756_s0 + $0x18] sm:$0xff]  ;;  %444 = vset.pattern.permute.xlu1 %v517_v6  ;;  %443 = vset.pattern.permute.xlu0 %v517_v6 }
   0x2   :  { %v145_v3 = vsel %vm138_vm0, %v542_v0, -inf  ;;  %v139_v4 = vsel %vm138_vm0, %v547_v1, -inf  ;;  %v561_v5 = vld [vmem:[%s756_s0 + $0x8] sm:$0xff]  ;;  %v148_v7 = vsel %vm138_vm0, %v552_v2, -inf  ;;  %v575_v10 = vld [vmem:[%s756_s0 + $0x20] sm:$0xff] }
   0x3   :  { %146 = vmax.xlane.f32.xlu1 %v145_v3  ;;  %140 = vmax.xlane.f32.xlu0 %v139_v4  ;;  %v142_v8 = vsel %vm138_vm0, %v561_v5, -inf  ;;  %v570_v9 = vld [vmem:[%s756_s0 + $0x28] sm:$0xff] }
   0x4   :  { %8 = vsyncpa [#allocation3], 0  ;;  %v154_v11 = vsel %vm138_vm0, %v570_v9, -inf  ;;  %v151_v12 = vsel %vm138_vm0, %v575_v10, -inf  ;;  %v584_v13 = vld [vmem:[%s756_s0 + $0x38] sm:$0xff]  ;;  %v589_v14 = vld [vmem:[%s756_s0 + $0x30] sm:$0xff]  ;;  %v104_v53 = vlaneseq }
   0x5   :  { %v160_v15 = vsel %vm138_vm0, %v584_v13, -inf  ;;  %v157_v16 = vsel %vm138_vm0, %v589_v14, -inf  ;;  %v97_v17 = vld [vmem:[%s757_s1 + $0x8] sm:$0xff]  ;;  %v98_v18 = vld [vmem:[%s757_s1 + $0x10] sm:$0xff]  ;;  %v96_v19 = vld [vmem:[%s757_s1] sm:$0xff]  ;;  %vm373_vm9 = vcmask 7168  }
   0x6   :  { %v99_v20 = vld [vmem:[%s757_s1 + $0x18] sm:$0xff]  ;;  %v100_v21 = vld [vmem:[%s757_s1 + $0x20] sm:$0xff]  ;;  %v101_v22 = vld [vmem:[%s757_s1 + $0x28] sm:$0xff]  ;;  %v655_v60 = vand.u32 127, %v104_v53  ;;  %s518_s4 = smov [#allocation2]  }
   0x7   :  { %149 = vmax.xlane.f32.xlu1 %v148_v7  ;;  %143 = vmax.xlane.f32.xlu0 %v142_v8  ;;  %v102_v23 = vld [vmem:[%s757_s1 + $0x30] sm:$0xff]  ;;  %v103_v24 = vld [vmem:[%s757_s1 + $0x38] sm:$0xff]  ;;  %s412_s0 = sshll.u32 %s518_s4, 4  ;;  %s413_s0 = int_to_ptr.vmem [resolvable:$true] %s412_s0 }
   0x8   :  { %vm400_vm11 = vcmp.eq.s32.totalorder %v655_v60, 0  ;;  %s493_s5 = scalar_lea.vmem %s413_s0, 128  ;;  %p498_p1 = scmp.lt.s32.totalorder %s413_s0, %s413_s0 }
   0x9   :  { %p494_p0 = scmp.ne.s32.totalorder %s413_s0, %s493_s5  ;;  %p499_p2 = scmp.lt.s32.totalorder %s493_s5, %s493_s5 }
   0xb   :  { %155 = vmax.xlane.f32.xlu1 %v154_v11  ;;  %152 = vmax.xlane.f32.xlu0 %v151_v12  ;;  %p500_p3 = por %p499_p2, %p498_p1 }
   0xd   :  { %p501_p4 = pnand %p500_p3, %p494_p0 }
   0xf   :  { %161 = vmax.xlane.f32.xlu1 %v160_v15  ;;  %158 = vmax.xlane.f32.xlu0 %v157_v16 }
  0x20   :  { %110 = vperm.xlu1 %444, %v97_v17  }
  0x24   :  { %113 = vperm.xlu1 %444, %v98_v18  }
  0x25   :  { %107 = vperm.xlu0 %443, %v96_v19  }
  0x28   :  { %116 = vperm.xlu1 %444, %v99_v20  }
  0x2c   :  { %119 = vperm.xlu1 %444, %v100_v21  }
  0x30   :  { %122 = vperm.xlu1 %444, %v101_v22  }
  0x34   :  { %125 = vperm.xlu1 %444, %v102_v23  }
  0x38   :  { %128 = vperm.xlu1 %444, %v103_v24  }
  0x90   :  { %v619_v25 = vpop.xlane.xlu1 %146  ;;  %v621_v26 = vpop.xlane.xlu0 %140 }
  0x91   :  { %v163_v27 = vsub.f32 %v547_v1, %v621_v26  ;;  %v165_v29 = vsub.f32 %v542_v0, %v619_v25 }
  0x93   :  { %v171_v28 = vmul.f32 1.442695, %v163_v27  ;;  %v175_v36 = vmul.f32 1.442695, %v165_v29 }
  0x94   :  { %v627_v30 = vpop.xlane.xlu1 %149  ;;  %v629_v31 = vpop.xlane.xlu0 %143 }
  0x95   :  { %v166_v32 = vsub.f32 %v552_v2, %v627_v30  ;;  %v164_v33 = vsub.f32 %v561_v5, %v629_v31  ;;  %445 = vpow2.f32 %v171_v28 }
  0x97   :  { %v177_v34 = vmul.f32 1.442695, %v166_v32  ;;  %v173_v35 = vmul.f32 1.442695, %v164_v33 }
  0x98   :  { %v635_v37 = vpop.xlane.xlu1 %155  ;;  %v637_v38 = vpop.xlane.xlu0 %152 }
  0x99   :  { %447 = vpow2.f32 %v177_v34  ;;  %v168_v39 = vsub.f32 %v570_v9, %v635_v37  ;;  %v167_v40 = vsub.f32 %v575_v10, %v637_v38 }
  0x9a   :  { %449 = vpow2.f32 %v173_v35 }
  0x9b   :  { %v181_v41 = vmul.f32 1.442695, %v168_v39  ;;  %v179_v42 = vmul.f32 1.442695, %v167_v40  ;;  %451 = vpow2.f32 %v175_v36 }
  0x9c   :  { %v643_v43 = vpop.xlane.xlu1 %161  ;;  %v645_v44 = vpop.xlane.xlu0 %158 }
  0x9d   :  { %453 = vpow2.f32 %v181_v41  ;;  %v170_v45 = vsub.f32 %v584_v13, %v643_v43  ;;  %v169_v46 = vsub.f32 %v589_v14, %v645_v44 }
  0x9e   :  { %455 = vpow2.f32 %v179_v42 }
  0x9f   :  { %v185_v47 = vmul.f32 1.442695, %v170_v45  ;;  %v183_v48 = vmul.f32 1.442695, %v169_v46  ;;  %v446_v49 = vpop.eup %445 }
  0xa0   :  { %v111_v50 = vpop.permute.xlu1 %110  ;;  %v187_v51 = vsel %vm138_vm0, %v446_v49, 0.0 }
  0xa1   :  { %457 = vpow2.f32 %v185_v47  ;;  %188 = vadd.xlane.f32.xlu1 %v187_v51  ;;  %vm131_vm1 = vcmp.eq.s32.totalorder %v655_v60, %v111_v50 }
  0xa2   :  { %459 = vpow2.f32 %v183_v48  ;;  %v236_v15 = vsel %vm131_vm1, %v561_v5, 0.0 }
  0xa3   :  { %v448_v52 = vpop.eup %447  ;;  %v246_v19 = vsel %vm138_vm0, %v236_v15, 0.0 }
  0xa4   :  { %v450_v54 = vpop.eup %449  ;;  %v114_v55 = vpop.permute.xlu1 %113  ;;  %v196_v56 = vsel %vm138_vm0, %v448_v52, 0.0 }
  0xa5   :  { %v190_v57 = vsel %vm138_vm0, %v450_v54, 0.0  ;;  %v452_v58 = vpop.eup %451  ;;  %197 = vadd.xlane.f32.xlu1 %v196_v56  ;;  %v108_v4 = vpop.permute.xlu0 %107  ;;  %vm132_vm4 = vcmp.eq.s32.totalorder %v655_v60, %v114_v55 }
  0xa6   :  { %191 = vadd.xlane.f32.xlu0 %v190_v57  ;;  %v193_v3 = vsel %vm138_vm0, %v452_v58, 0.0  ;;  %vm130_vm2 = vcmp.eq.s32.totalorder %v655_v60, %v108_v4 }
  0xa7   :  { %v454_v59 = vpop.eup %453  ;;  %v235_v18 = vsel %vm130_vm2, %v547_v1, 0.0  ;;  %v237_v1 = vsel %vm132_vm4, %v542_v0, 0.0 }
  0xa8   :  { %v456_v61 = vpop.eup %455  ;;  %v117_v62 = vpop.permute.xlu1 %116  ;;  %v202_v63 = vsel %vm138_vm0, %v454_v59, 0.0  ;;  %v243_v21 = vsel %vm138_vm0, %v235_v18, 0.0  ;;  %v249_v27 = vsel %vm138_vm0, %v237_v1, 0.0 }
  0xa9   :  { %203 = vadd.xlane.f32.xlu1 %v202_v63  ;;  %v199_v7 = vsel %vm138_vm0, %v456_v61, 0.0  ;;  %vm133_vm3 = vcmp.eq.s32.totalorder %v655_v60, %v117_v62 }
  0xaa   :  { %194 = vadd.xlane.f32.xlu0 %v193_v3  ;;  %v238_v20 = vsel %vm133_vm3, %v552_v2, 0.0 }
  0xab   :  { %v458_v6 = vpop.eup %457  ;;  %v252_v22 = vsel %vm138_vm0, %v238_v20, 0.0 }
  0xac   :  { %v460_v8 = vpop.eup %459  ;;  %v120_v11 = vpop.permute.xlu1 %119  ;;  %v208_v12 = vsel %vm138_vm0, %v458_v6, 0.0 }
  0xad   :  { %209 = vadd.xlane.f32.xlu1 %v208_v12  ;;  %v205_v16 = vsel %vm138_vm0, %v460_v8, 0.0  ;;  %vm134_vm6 = vcmp.eq.s32.totalorder %v655_v60, %v120_v11 }
  0xae   :  { %200 = vadd.xlane.f32.xlu0 %v199_v7  ;;  %v239_v29 = vsel %vm134_vm6, %v575_v10, 0.0 }
  0xaf   :  { %v255_v0 = vsel %vm138_vm0, %v239_v29, 0.0 }
  0xb0   :  { %v123_v17 = vpop.permute.xlu1 %122 }
  0xb1   :  { %247 = vadd.xlane.f32.xlu1 %v246_v19  ;;  %vm135_vm5 = vcmp.eq.s32.totalorder %v655_v60, %v123_v17 }
  0xb2   :  { %206 = vadd.xlane.f32.xlu0 %v205_v16  ;;  %v240_v23 = vsel %vm135_vm5, %v570_v9, 0.0 }
  0xb3   :  { %v258_v2 = vsel %vm138_vm0, %v240_v23, 0.0 }
  0xb4   :  { %v126_v5 = vpop.permute.xlu1 %125 }
  0xb5   :  { %253 = vadd.xlane.f32.xlu1 %v252_v22  ;;  %vm136_vm8 = vcmp.eq.s32.totalorder %v655_v60, %v126_v5 }
  0xb6   :  { %244 = vadd.xlane.f32.xlu0 %v243_v21  ;;  %v241_v32 = vsel %vm136_vm8, %v589_v14, 0.0 }
  0xb7   :  { %v261_v33 = vsel %vm138_vm0, %v241_v32, 0.0 }
  0xb8   :  { %v129_v24 = vpop.permute.xlu1 %128 }
  0xb9   :  { %vm137_vm7 = vcmp.eq.s32.totalorder %v655_v60, %v129_v24  ;;  %259 = vadd.xlane.f32.xlu1 %v258_v2 }
  0xba   :  { %250 = vadd.xlane.f32.xlu0 %v249_v27  ;;  %v242_v28 = vsel %vm137_vm7, %v584_v13, 0.0 }
  0xbb   :  { %v264_v9 = vsel %vm138_vm0, %v242_v28, 0.0 }
  0xbd   :  { %265 = vadd.xlane.f32.xlu1 %v264_v9 }
  0xbe   :  { %256 = vadd.xlane.f32.xlu0 %v255_v0 }
  0xc2   :  { %262 = vadd.xlane.f32.xlu0 %v261_v33 }
 0x12e   :  { %v189_v34 = vpop.xlane.xlu1 %188 }
 0x12f   :  { %461 = vlog2.f32 %v189_v34 }
 0x132   :  { %v198_v35 = vpop.xlane.xlu1 %197 }
 0x133   :  { %v192_v36 = vpop.xlane.xlu0 %191  ;;  %463 = vlog2.f32 %v198_v35 }
 0x134   :  { %465 = vlog2.f32 %v192_v36 }
 0x136   :  { %v204_v10 = vpop.xlane.xlu1 %203 }
 0x137   :  { %v195_v13 = vpop.xlane.xlu0 %194  ;;  %467 = vlog2.f32 %v204_v10 }
 0x138   :  { %469 = vlog2.f32 %v195_v13 }
 0x139   :  { %v462_v39 = vpop.eup %461 }
 0x13a   :  { %v210_v40 = vpop.xlane.xlu1 %209  ;;  %v212_v14 = vmul.f32 0.6931472, %v462_v39 }
 0x13b   :  { %v201_v41 = vpop.xlane.xlu0 %200  ;;  %471 = vlog2.f32 %v210_v40 }
 0x13c   :  { %473 = vlog2.f32 %v201_v41  ;;  %v227_v54 = vadd.f32 %v212_v14, %v621_v26 }
 0x13d   :  { %v464_v42 = vpop.eup %463 }
 0x13e   :  { %v466_v45 = vpop.eup %465  ;;  %v218_v46 = vmul.f32 0.6931472, %v464_v42  ;;  %v248_v47 = vpop.xlane.xlu1 %247 }
 0x13f   :  { %v207_v48 = vpop.xlane.xlu0 %206  ;;  %v214_v49 = vmul.f32 0.6931472, %v466_v45  ;;  %v324_v45 = vld [vmem:[%s758_s2 + $0x8] sm:$0xff] }
 0x140   :  { %475 = vlog2.f32 %v207_v48  ;;  %v230_v50 = vadd.f32 %v218_v46, %v627_v30 }
 0x141   :  { %v468_v51 = vpop.eup %467  ;;  %v228_v52 = vadd.f32 %v214_v49, %v629_v31 }
 0x142   :  { %v470_v55 = vpop.eup %469  ;;  %v222_v56 = vmul.f32 0.6931472, %v468_v51  ;;  %v254_v57 = vpop.xlane.xlu1 %253  ;;  %v323_v51 = vld [vmem:[%s758_s2] sm:$0xff] }
 0x143   :  { %v245_v58 = vpop.xlane.xlu0 %244  ;;  %v216_v59 = vmul.f32 0.6931472, %v470_v55  ;;  %v268_v61 = vsub.f32 %v228_v52, %v248_v47  ;;  %v689_v62 = vsub.f32 %v230_v50, %v254_v57 }
 0x144   :  { %v691_v63 = vsub.f32 %v227_v54, %v245_v58  ;;  %v232_v3 = vadd.f32 %v222_v56, %v635_v37  ;;  %v326_v58 = vld [vmem:[%s758_s2 + $0x18] sm:$0xff] }
 0x145   :  { %v472_v4 = vpop.eup %471  ;;  %v276_v6 = vsub.f32 0.0, %v268_v61  ;;  %v278_v30 = vsub.f32 0.0, %v689_v62  ;;  %v229_v26 = vadd.f32 %v216_v59, %v619_v25 }
 0x146   :  { %v275_v31 = vsub.f32 0.0, %v691_v63  ;;  %v474_v7 = vpop.eup %473  ;;  %v226_v8 = vmul.f32 0.6931472, %v472_v4  ;;  %v260_v11 = vpop.xlane.xlu1 %259 }
 0x147   :  { %v251_v12 = vpop.xlane.xlu0 %250  ;;  %v220_v15 = vmul.f32 0.6931472, %v474_v7  ;;  %v285_v16 = vmul.f32 1.442695, %v276_v6  ;;  %v289_v17 = vmul.f32 1.442695, %v278_v30  ;;  %v697_v18 = vsub.f32 %v232_v3, %v260_v11 }
 0x148   :  { %v283_v19 = vmul.f32 1.442695, %v275_v31  ;;  %v269_v20 = vsub.f32 %v229_v26, %v251_v12  ;;  %v234_v37 = vadd.f32 %v226_v8, %v643_v43  ;;  %v325_v6 = vld [vmem:[%s758_s2 + $0x10] sm:$0xff] }
 0x149   :  { %477 = vpow2.f32 %v285_v16  ;;  %v280_v5 = vsub.f32 0.0, %v697_v18  ;;  %v231_v22 = vadd.f32 %v220_v15, %v637_v38 }
 0x14a   :  { %v476_v21 = vpop.eup %475  ;;  %479 = vpow2.f32 %v289_v17  ;;  %v277_v23 = vsub.f32 0.0, %v269_v20  ;;  %v266_v1 = vpop.xlane.xlu1 %265 }
 0x14b   :  { %v224_v25 = vmul.f32 0.6931472, %v476_v21  ;;  %v257_v24 = vpop.xlane.xlu0 %256  ;;  %481 = vpow2.f32 %v283_v19  ;;  %v293_v2 = vmul.f32 1.442695, %v280_v5  ;;  %v702_v27 = vsub.f32 %v234_v37, %v266_v1  ;;  %v328_v19 = vld [vmem:[%s758_s2 + $0x28] sm:$0xff]  ;;  %v327_v37 = vld [vmem:[%s758_s2 + $0x20] sm:$0xff] }
 0x14c   :  { %v271_v28 = vsub.f32 %v231_v22, %v257_v24  ;;  %v287_v29 = vmul.f32 1.442695, %v277_v23 }
 0x14d   :  { %v233_v9 = vadd.f32 %v224_v25, %v645_v44  ;;  %483 = vpow2.f32 %v293_v2  ;;  %v282_v43 = vsub.f32 0.0, %v702_v27  ;;  %v329_v2 = vld [vmem:[%s758_s2 + $0x30] sm:$0xff] }
 0x14e   :  { %v279_v0 = vsub.f32 0.0, %v271_v28  ;;  %485 = vpow2.f32 %v287_v29 }
 0x14f   :  { %v263_v32 = vpop.xlane.xlu0 %262  ;;  %v297_v38 = vmul.f32 1.442695, %v282_v43 }
 0x150   :  { %v291_v33 = vmul.f32 1.442695, %v279_v0  ;;  %v273_v34 = vsub.f32 %v233_v9, %v263_v32  ;;  %v330_v9 = vld [vmem:[%s758_s2 + $0x38] sm:$0xff] }
 0x151   :  { %487 = vpow2.f32 %v297_v38 }
 0x152   :  { %v281_v35 = vsub.f32 0.0, %v273_v34  ;;  %489 = vpow2.f32 %v291_v33 }
 0x153   :  { %v478_v36 = vpop.eup %477 }
 0x154   :  { %v295_v10 = vmul.f32 1.442695, %v281_v35  ;;  %v480_v13 = vpop.eup %479  ;;  %v300_v39 = vsub.f32 1.0, %v478_v36 }
 0x155   :  { %v482_v40 = vpop.eup %481  ;;  %v302_v41 = vsub.f32 1.0, %v480_v13 }
 0x156   :  { %491 = vpow2.f32 %v295_v10  ;;  %v308_v44 = vmul.f32 %v300_v39, %v300_v39  ;;  %v299_v42 = vsub.f32 1.0, %v482_v40 }
 0x157   :  { %v484_v14 = vpop.eup %483  ;;  %v310_v46 = vmul.f32 %v302_v41, %v302_v41 }
 0x158   :  { %v486_v47 = vpop.eup %485  ;;  %v316_v48 = vmul.f32 %v308_v44, %v268_v61  ;;  %v307_v49 = vmul.f32 %v299_v42, %v299_v42  ;;  %v304_v50 = vsub.f32 1.0, %v484_v14 }
 0x159   :  { %v301_v52 = vsub.f32 1.0, %v486_v47  ;;  %v318_v55 = vmul.f32 %v310_v46, %v689_v62 }
 0x15a   :  { %v332_v54 = vmul.f32 %v324_v45, %v316_v48  ;;  %v315_v56 = vmul.f32 %v307_v49, %v691_v63  ;;  %v312_v59 = vmul.f32 %v304_v50, %v304_v50  ;;  %v340_v45 = vshrl.u32 %v104_v53, 7 }
 0x15b   :  { %v488_v57 = vpop.eup %487  ;;  %v309_v61 = vmul.f32 %v301_v52, %v301_v52  ;;  %v334_v7 = vmul.f32 %v326_v58, %v318_v55 }
 0x15c   :  { %v490_v3 = vpop.eup %489  ;;  %v331_v4 = vmul.f32 %v323_v51, %v315_v56  ;;  %v306_v30 = vsub.f32 1.0, %v488_v57  ;;  %v375_v31 = vsel %vm373_vm9, %v332_v54, 0.0  ;;  %v320_v11 = vmul.f32 %v312_v59, %v697_v18 }
 0x15d   :  { %v317_v26 = vmul.f32 %v309_v61, %v269_v20  ;;  %v303_v62 = vsub.f32 1.0, %v490_v3  ;;  %v379_v18 = vsel %vm373_vm9, %v334_v7, 0.0  ;;  %vm399_vm10 = vcmp.eq.s32.totalorder %v340_v45, 0 }
 0x15e   :  { %v374_v63 = vsel %vm373_vm9, %v331_v4, 0.0  ;;  %v314_v15 = vmul.f32 %v306_v30, %v306_v30  ;;  %v336_v23 = vmul.f32 %v328_v19, %v320_v11  ;;  %vm401_vm12 = vmand %vm399_vm10, %vm400_vm11 }
 0x15f   :  { %v333_v12 = vmul.f32 %v325_v6, %v317_v26  ;;  %v311_v16 = vmul.f32 %v303_v62, %v303_v62  ;;  %v376_v17 = vadd.f32 %v375_v31, %v374_v63 }
 0x160   :  { %v492_v8 = vpop.eup %491  ;;  %v322_v1 = vmul.f32 %v314_v15, %v702_v27  ;;  %v383_v33 = vsel %vm373_vm9, %v336_v23, 0.0 }
 0x161   :  { %v305_v20 = vsub.f32 1.0, %v492_v8  ;;  %v377_v21 = vsel %vm373_vm9, %v333_v12, 0.0  ;;  %v319_v5 = vmul.f32 %v311_v16, %v271_v28 }
 0x162   :  { %v378_v22 = vadd.f32 %v377_v21, %v376_v17  ;;  %v338_v38 = vmul.f32 %v330_v9, %v322_v1 }
 0x163   :  { %v313_v25 = vmul.f32 %v305_v20, %v305_v20  ;;  %v335_v24 = vmul.f32 %v327_v37, %v319_v5 }
 0x164   :  { %v380_v43 = vadd.f32 %v379_v18, %v378_v22  ;;  %v387_v10 = vsel %vm373_vm9, %v338_v38, 0.0 }
 0x165   :  { %v321_v29 = vmul.f32 %v313_v25, %v273_v34  ;;  %v381_v28 = vsel %vm373_vm9, %v335_v24, 0.0 }
 0x166   :  { %v382_v32 = vadd.f32 %v381_v28, %v380_v43 }
 0x167   :  { %v337_v0 = vmul.f32 %v329_v2, %v321_v29 }
 0x168   :  { %v384_v35 = vadd.f32 %v383_v33, %v382_v32 }
 0x169   :  { %v385_v27 = vsel %vm373_vm9, %v337_v0, 0.0 }
 0x16a   :  { %v386_v36 = vadd.f32 %v385_v27, %v384_v35 }
 0x16c   :  { %v388_v13 = vadd.f32 %v387_v10, %v386_v36 }
 0x16e   :  { %389 = vadd.xlane.f32.xlu0 %v388_v13 }
 0x1fb   :  { %v390_v34 = vpop.xlane.xlu0 %389 }
 0x1fc   :  { %v391_v39 = vrot.slane %v390_v34, 4 }
 0x1fe   :  { %v392_v40 = vadd.f32 %v391_v39, %v390_v34 }
 0x200   :  { %v393_v41 = vrot.slane %v392_v40, 2 }
 0x202   :  { %v394_v44 = vadd.f32 %v393_v41, %v392_v40 }
 0x204   :  { %v395_v42 = vrot.slane %v394_v44, 1 }
 0x206   :  { %v396_v14 = vadd.f32 %v395_v42, %v394_v44 }
 0x208   :  { %438 = vpush %v396_v14 }
 0x239   :  { %s439_s2 = spop %438 }
 0x23a   :  { %v402_v46 = vstv %s439_s2 }
 0x23b   :  { %v403_v47 = vsel %vm401_vm12, %v402_v46, 0.0 }
 0x23c   :  { %405 = vst [vmem:[#allocation2] sm:$0xff] %v403_v47 }
 0x23d   :  { %504 = shalt.err (!%p501_p4)
}
 0x23e   :  { %s505_s8 = scalar_lea.hbm %s759_s3, 128 }
 0x23f   :  { %p506_p5 = scmp.ne.s32.totalorder %s759_s3, %s505_s8  ;;  %p509_p6 = scmp.lt.u32.totalorder %s505_s8, %s759_s3 }
 0x241   :  { %p511_p7 = pnand %p509_p6, %p506_p5 }
 0x243   :  { %514 = shalt.err (!%p511_p7)
}
 0x244   :  { %415 = dma.vmem_to_hbm [thread:$0]  %s413_s0, 128, %s759_s3, [#allocation3]  }
 0x245   :  { %515 = dma.done.wait [#allocation3], 128  }
 0x246   :  { %516 = vsyncadd [#allocation3], 4294967168 }
 0x247   :  { %419 = vsyncpa [#allocation3], 1 }

</bundles_post_ra>
